<compile_context>
chip_gen: v7x
topology: tpu7x:2x2x1
jax: 0.10.0
libtpu: 0.0.40
codegen_flags: <defaults>
</compile_context>

<pallas_src>
import functools
import math

import jax
import jax.numpy as jnp
import numpy as np
from jax.experimental import pallas as pl
from jax.experimental.pallas import tpu as pltpu


def _round_up(x, m):
    return (x + m - 1) // m * m


# --------------------------------------------------------------------------------------
# In-kernel helper: one 3x3 "same" conv + bias + ReLU in the width-padded flat domain.
#
#   x      : (C, Lp) f32 value; pixel (i, j) at column i*Wpad + j (j < Wp valid; columns with
#            j >= Wp and columns >= L are junk and are zeroed via `mask` before padding).
#   w_ref  : (9, Cout, C) tap-major packed weights: w_ref[t, co, ci] = W[dy, dx, ci, co].
#   b_ref  : (Cout, 1) bias.
#   mask   : (1, Lp) 1.0 on valid columns, 0.0 elsewhere.
#   f_ref  : (C, Lf) VMEM scratch, Lf = 2*Wpad + 2 + Lp  -- zero-bordered flat padded image.
# Output layout equals input layout, so stages chain without any re-layout.
# --------------------------------------------------------------------------------------
def _conv3x3_relu(x, w_ref, b_ref, mask, f_ref, *, Wpad, Lp):
    C = x.shape[0]
    Lf = f_ref.shape[1]

    # Zero only the border slabs NOT covered by the interior write below (small, every step).
    f_ref[:, 0:Wpad + 1] = jnp.zeros((C, Wpad + 1), jnp.float32)
    f_ref[:, Wpad + 1 + Lp:Lf] = jnp.zeros((C, Lf - (Wpad + 1 + Lp)), jnp.float32)

    # Drop the masked flat image into the interior of the padded buffer.  Masked junk
    # columns land exactly on the left/right border positions of the padded image -> zero.
    f_ref[:, Wpad + 1:Wpad + 1 + Lp] = x * mask

    # 9 accumulated tap matmuls on the MXU (no materialized im2col patch matrix).
    acc = None
    for t in range(9):
        dy, dx = divmod(t, 3)
        off = dy * Wpad + dx
        part = jnp.dot(w_ref[t], f_ref[:, off:off + Lp],
                       preferred_element_type=jnp.float32)
        acc = part if acc is None else acc + part

    return jnp.maximum(acc + b_ref[...], 0.0)


# ------------------------------- B=False: fully fused kernel ---------------------------
def _double_conv_kernel(x_ref, w1_ref, b1_ref, w2_ref, b2_ref, mask_ref, o_ref,
                        f1, f2, *, Wpad, Lp):
    m = mask_ref[...]
    y1 = _conv3x3_relu(x_ref[0].astype(jnp.float32), w1_ref, b1_ref, m, f1, Wpad=Wpad, Lp=Lp)
    y2 = _conv3x3_relu(y1, w2_ref, b2_ref, m, f2, Wpad=Wpad, Lp=Lp)
    o_ref[0] = y2.astype(o_ref.dtype)


def _fused_double_conv(x_flat, w1m, b1, w2m, b2, mask, *, Wpad, Lp):
    N, Cin, _ = x_flat.shape
    Cout = w1m.shape[1]
    Lf = 2 * Wpad + 2 + Lp
    kernel = functools.partial(_double_conv_kernel, Wpad=Wpad, Lp=Lp)
    return pl.pallas_call(
        kernel,
        out_shape=jax.ShapeDtypeStruct((N, Cout, Lp), x_flat.dtype),
        grid_spec=pltpu.PrefetchScalarGridSpec(
            num_scalar_prefetch=0,
            grid=(N,),
            in_specs=[
                pl.BlockSpec((1, Cin, Lp), lambda n: (n, 0, 0)),
                pl.BlockSpec((9, Cout, Cin), lambda n: (0, 0, 0)),
                pl.BlockSpec((Cout, 1), lambda n: (0, 0)),
                pl.BlockSpec((9, Cout, Cout), lambda n: (0, 0, 0)),
                pl.BlockSpec((Cout, 1), lambda n: (0, 0)),
                pl.BlockSpec((1, Lp), lambda n: (0, 0)),
            ],
            out_specs=pl.BlockSpec((1, Cout, Lp), lambda n: (n, 0, 0)),
            scratch_shapes=[
                pltpu.VMEM((Cin, Lf), jnp.float32),
                pltpu.VMEM((Cout, Lf), jnp.float32),
            ],
        ),
        compiler_params=pltpu.CompilerParams(
            dimension_semantics=("parallel",),
            vmem_limit_bytes=48 * 1024 * 1024,
        ),
    )(x_flat, w1m, b1, w2m, b2, mask)


# -------------------- B=True: conv stage with optional input affine + BN stats ----------
def _conv_bn_stage_kernel(x_ref, w_ref, b_ref, a_ref, c_ref, mask_ref,
                          o_ref, stats_ref, f, *, Wpad, Lp, apply_affine):
    m = mask_ref[...]
    x = x_ref[0].astype(jnp.float32)
    if apply_affine:
        # Previous layer's BatchNorm applied in-kernel, per input channel.
        x = x * a_ref[...] + c_ref[...]
    y = _conv3x3_relu(x, w_ref, b_ref, m, f, Wpad=Wpad, Lp=Lp)
    o_ref[0] = y.astype(o_ref.dtype)
    # Per-sample, per-channel sum / sum-of-squares over valid pixels (for BatchNorm).
    ym = y * m
    stats_ref[0, :, 0:1] = jnp.sum(ym, axis=1, keepdims=True)
    stats_ref[0, :, 1:2] = jnp.sum(ym * ym, axis=1, keepdims=True)


def _conv_bn_stage(x_flat, wm, b, a, c, mask, *, Wpad, Lp, apply_affine):
    N, Cin, _ = x_flat.shape
    Cout = wm.shape[1]
    Lf = 2 * Wpad + 2 + Lp
    kernel = functools.partial(_conv_bn_stage_kernel, Wpad=Wpad, Lp=Lp,
                               apply_affine=apply_affine)
    return pl.pallas_call(
        kernel,
        out_shape=(jax.ShapeDtypeStruct((N, Cout, Lp), x_flat.dtype),
                   jax.ShapeDtypeStruct((N, Cout, 2), jnp.float32)),
        grid_spec=pltpu.PrefetchScalarGridSpec(
            num_scalar_prefetch=0,
            grid=(N,),
            in_specs=[
                pl.BlockSpec((1, Cin, Lp), lambda n: (n, 0, 0)),
                pl.BlockSpec((9, Cout, Cin), lambda n: (0, 0, 0)),
                pl.BlockSpec((Cout, 1), lambda n: (0, 0)),
                pl.BlockSpec((Cin, 1), lambda n: (0, 0)),
                pl.BlockSpec((Cin, 1), lambda n: (0, 0)),
                pl.BlockSpec((1, Lp), lambda n: (0, 0)),
            ],
            out_specs=[pl.BlockSpec((1, Cout, Lp), lambda n: (n, 0, 0)),
                       pl.BlockSpec((1, Cout, 2), lambda n: (n, 0, 0))],
            scratch_shapes=[pltpu.VMEM((Cin, Lf), jnp.float32)],
        ),
        compiler_params=pltpu.CompilerParams(
            dimension_semantics=("parallel",),
            vmem_limit_bytes=48 * 1024 * 1024,
        ),
    )(x_flat, wm, b, a, c, mask)


# ------------------------------------ forward wrapper -----------------------------------
def down_block_forward(x_nchw, params, *, B):
    """DownBlock.forward: maxpool(2) -> conv3x3 -> relu -> [bn] -> conv3x3 -> relu -> [bn]."""
    N, Cin, H, W = x_nchw.shape
    Hp, Wp = H // 2, W // 2
    Wpad = Wp + 2
    L = Hp * Wpad
    Lp = _round_up(L, 128)          # lane-dense flat length
    Cout = params["w1"].shape[-1]
    eps = 1e-5

    # 2x2 max-pool + right width-pad (2 junk cols/row) + flatten + lane-pad to Lp.
    # One cheap fused XLA pass over the input, no transposes; output is the kernels'
    # "width-padded flat" domain: pixel (i, j) at column i*Wpad + j.
    # TODO(synk): fold the pool into the stage-1 kernel load path (strided DMA + VPU max).
    xp = jnp.maximum(jnp.maximum(x_nchw[:, :, ::2, ::2], x_nchw[:, :, ::2, 1::2]),
                     jnp.maximum(x_nchw[:, :, 1::2, ::2], x_nchw[:, :, 1::2, 1::2]))
    x_flat = jnp.pad(xp, ((0, 0), (0, 0), (0, 0), (0, 2))).reshape(N, Cin, L)
    x_flat = jnp.pad(x_flat, ((0, 0), (0, 0), (0, Lp - L)))

    # Tap-major packed weights (9, Cout, Cin_stage): w[t, co, ci] = W[dy, dx, ci, co].
    w1m = jnp.transpose(params["w1"], (0, 1, 3, 2)).reshape(9, Cout, Cin)
    w2m = jnp.transpose(params["w2"], (0, 1, 3, 2)).reshape(9, Cout, Cout)
    b1 = params["b1"].reshape(Cout, 1)
    b2 = params["b2"].reshape(Cout, 1)

    # Valid-column mask for the flat domain: zero the 2 junk columns per row and the lane tail.
    col = np.arange(Lp)
    valid = (col < L) & ((col % Wpad) < Wp)
    mask = jnp.asarray(valid.astype(np.float32)).reshape(1, Lp)

    if not B:
        y2 = _fused_double_conv(x_flat, w1m, b1, w2m, b2, mask, Wpad=Wpad, Lp=Lp)
        return y2[:, :, :L].reshape(N, Cout, Hp, Wpad)[:, :, :, :Wp]

    cnt = float(N * Hp * Wp)

    # Stage 1: conv1 + ReLU, plus per-sample BN1 statistics (identity affine elided).
    ones = jnp.ones((Cin, 1), jnp.float32)
    zeros = jnp.zeros((Cin, 1), jnp.float32)
    y1, s1 = _conv_bn_stage(x_flat, w1m, b1, ones, zeros, mask,
                            Wpad=Wpad, Lp=Lp, apply_affine=False)
    t1 = jnp.sum(s1, axis=0)                      # (Cout, 2) tiny XLA cross-sample reduce
    mean1 = t1[:, 0] / cnt
    # Single-pass E[x^2]-E[x]^2 (post-ReLU magnitudes -> cancellation risk accepted).
    var1 = t1[:, 1] / cnt - mean1 * mean1
    a1 = params["g1"] * jax.lax.rsqrt(var1 + eps)
    c1 = params["be1"] - mean1 * a1

    # Stage 2: BN1 applied in-kernel, conv2 + ReLU, plus per-sample BN2 statistics.
    y2, s2 = _conv_bn_stage(y1, w2m, b2, a1.reshape(Cout, 1), c1.reshape(Cout, 1),
                            mask, Wpad=Wpad, Lp=Lp, apply_affine=True)
    t2 = jnp.sum(s2, axis=0)
    mean2 = t2[:, 0] / cnt
    var2 = t2[:, 1] / cnt - mean2 * mean2
    a2 = params["g2"] * jax.lax.rsqrt(var2 + eps)
    c2 = params["be2"] - mean2 * a2

    # BN2 affine folded into the (unavoidable) junk-column compaction slice.
    out = y2[:, :, :L].reshape(N, Cout, Hp, Wpad)[:, :, :, :Wp]
    return out * a2.reshape(1, Cout, 1, 1) + c2.reshape(1, Cout, 1, 1)


# ---------------- pure-JAX reference (matches PyTorch semantics, NCHW) ----------------
def reference_downblock(x_nchw, params, *, B):
    def conv(z, w_hwio, b):
        w_oihw = jnp.transpose(w_hwio, (3, 2, 0, 1))
        out = jax.lax.conv_general_dilated(
            z, w_oihw, window_strides=(1, 1), padding="SAME",
            dimension_numbers=("NCHW", "OIHW", "NCHW"),
            precision=jax.lax.Precision.HIGHEST)
        return out + b.reshape(1, -1, 1, 1)

    def bn(z, g, be):
        mean = jnp.mean(z, axis=(0, 2, 3), keepdims=True)
        var = jnp.mean((z - mean) ** 2, axis=(0, 2, 3), keepdims=True)
        return (z - mean) / jnp.sqrt(var + 1e-5) * g.reshape(1, -1, 1, 1) + be.reshape(1, -1, 1, 1)

    y = jax.lax.reduce_window(x_nchw, -jnp.inf, jax.lax.max,
                              window_dimensions=(1, 1, 2, 2),
                              window_strides=(1, 1, 2, 2),
                              padding="VALID")
    y = jax.nn.relu(conv(y, params["w1"], params["b1"]))
    if B:
        y = bn(y, params["g1"], params["be1"])
    y = jax.nn.relu(conv(y, params["w2"], params["b2"]))
    if B:
        y = bn(y, params["g2"], params["be2"])
    return y


if __name__ == "__main__":
    key = jax.random.PRNGKey(0)
    N, Cin, H, W = 2, 4, 16, 16
    Cout = 8
    ks = jax.random.split(key, 9)

    x = jax.random.normal(ks[0], (N, Cin, H, W), jnp.float32)
    params = {
        "w1": jax.random.normal(ks[1], (3, 3, Cin, Cout), jnp.float32) / math.sqrt(9 * Cin),
        "b1": 0.05 * jax.random.normal(ks[2], (Cout,), jnp.float32),
        "w2": jax.random.normal(ks[3], (3, 3, Cout, Cout), jnp.float32) / math.sqrt(9 * Cout),
        "b2": 0.05 * jax.random.normal(ks[4], (Cout,), jnp.float32),
        "g1": 1.0 + 0.1 * jax.random.normal(ks[5], (Cout,), jnp.float32),
        "be1": 0.1 * jax.random.normal(ks[6], (Cout,), jnp.float32),
        "g2": 1.0 + 0.1 * jax.random.normal(ks[7], (Cout,), jnp.float32),
        "be2": 0.1 * jax.random.normal(ks[8], (Cout,), jnp.float32),
    }

    fwd = jax.jit(down_block_forward, static_argnames=("B",))

    ok = True
    for B in (False, True):
        out = jax.block_until_ready(fwd(x, params, B=B))
        ref = jax.block_until_ready(reference_downblock(x, params, B=B))
        assert out.shape == (N, Cout, H // 2, W // 2), out.shape
        if not np.allclose(np.asarray(out), np.asarray(ref), rtol=2e-2, atol=2e-2):
            ok = False
            print("max abs diff (B=%s):" % B,
                  float(np.max(np.abs(np.asarray(out) - np.asarray(ref)))))

    if ok:
        print("KERNEL_OK")
</pallas_src>

<mosaic_0001>
module attributes {stable_mosaic.version = 11 : i64} {
  func.func @_double_conv_kernel(%arg0: i32, %arg1: memref<1x4x128xf32, #tpu.memory_space<vmem>>, %arg2: memref<9x8x4xf32, #tpu.memory_space<vmem>>, %arg3: memref<8x1xf32, #tpu.memory_space<vmem>>, %arg4: memref<9x8x8xf32, #tpu.memory_space<vmem>>, %arg5: memref<8x1xf32, #tpu.memory_space<vmem>>, %arg6: memref<1x128xf32, #tpu.memory_space<vmem>>, %arg7: memref<1x8x128xf32, #tpu.memory_space<vmem>>, %arg8: memref<4x150xf32, #tpu.memory_space<vmem>>, %arg9: memref<8x150xf32, #tpu.memory_space<vmem>>) attributes {dimension_semantics = [#tpu.dimension_semantics<parallel>], iteration_bounds = array<i64: 2>, scalar_prefetch = 0 : i64, scratch_operands = 2 : i64, tpu.core_type = #tpu.core_type<tc>, window_params = [{transform_indices = @transform_0, window_bounds = array<i64: 1, 4, 128>}, {pipeline_mode = #tpu.pipeline_mode<synchronous>, transform_indices = @transform_1, window_bounds = array<i64: 9, 8, 4>}, {pipeline_mode = #tpu.pipeline_mode<synchronous>, transform_indices = @transform_2, window_bounds = array<i64: 8, 1>}, {pipeline_mode = #tpu.pipeline_mode<synchronous>, transform_indices = @transform_3, window_bounds = array<i64: 9, 8, 8>}, {pipeline_mode = #tpu.pipeline_mode<synchronous>, transform_indices = @transform_4, window_bounds = array<i64: 8, 1>}, {pipeline_mode = #tpu.pipeline_mode<synchronous>, transform_indices = @transform_5, window_bounds = array<i64: 1, 128>}, {transform_indices = @transform_6, window_bounds = array<i64: 1, 8, 128>}]} {
    %c0 = arith.constant 0 : index
    %c0_0 = arith.constant 0 : index
    %0 = vector.load %arg6[%c0, %c0_0] : memref<1x128xf32, #tpu.memory_space<vmem>>, vector<1x128xf32>
    %c0_1 = arith.constant 0 : index
    %c0_2 = arith.constant 0 : index
    %c0_3 = arith.constant 0 : index
    %1 = vector.load %arg1[%c0_1, %c0_2, %c0_3] : memref<1x4x128xf32, #tpu.memory_space<vmem>>, vector<1x4x128xf32>
    %2 = vector.shape_cast %1 : vector<1x4x128xf32> to vector<4x128xf32>
    %cst = arith.constant 0.000000e+00 : f32
    %3 = vector.broadcast %cst : f32 to vector<4x11xf32>
    %c0_4 = arith.constant 0 : index
    %c0_5 = arith.constant 0 : index
    %4 = vector.load %arg8[%c0_4, %c0_5] : memref<4x150xf32, #tpu.memory_space<vmem>>, vector<4x11xf32>
    tpu.vector_store %arg8[%c0_4, %c0_5], %3 {strides = array<i32>} : memref<4x150xf32, #tpu.memory_space<vmem>>, vector<4x11xf32>,
    %cst_6 = arith.constant 0.000000e+00 : f32
    %5 = vector.broadcast %cst_6 : f32 to vector<4x11xf32>
    %c0_7 = arith.constant 0 : index
    %c139 = arith.constant 139 : index
    %6 = vector.load %arg8[%c0_7, %c139] : memref<4x150xf32, #tpu.memory_space<vmem>>, vector<4x11xf32>
    tpu.vector_store %arg8[%c0_7, %c139], %5 {strides = array<i32>} : memref<4x150xf32, #tpu.memory_space<vmem>>, vector<4x11xf32>,
    %7 = vector.broadcast %0 : vector<1x128xf32> to vector<4x128xf32>
    %8 = arith.mulf %2, %7 : vector<4x128xf32>
    %c0_8 = arith.constant 0 : index
    %c11 = arith.constant 11 : index
    %9 = vector.load %arg8[%c0_8, %c11] : memref<4x150xf32, #tpu.memory_space<vmem>>, vector<4x128xf32>
    tpu.vector_store %arg8[%c0_8, %c11], %8 {strides = array<i32>} : memref<4x150xf32, #tpu.memory_space<vmem>>, vector<4x128xf32>,
    %c0_9 = arith.constant 0 : index
    %c0_10 = arith.constant 0 : index
    %c0_11 = arith.constant 0 : index
    %10 = vector.load %arg2[%c0_9, %c0_10, %c0_11] : memref<9x8x4xf32, #tpu.memory_space<vmem>>, vector<1x8x4xf32>
    %11 = vector.shape_cast %10 : vector<1x8x4xf32> to vector<8x4xf32>
    %c0_12 = arith.constant 0 : index
    %c0_13 = arith.constant 0 : index
    %12 = vector.load %arg8[%c0_12, %c0_13] : memref<4x150xf32, #tpu.memory_space<vmem>>, vector<4x128xf32>
    %cst_14 = arith.constant dense<0.000000e+00> : vector<8x128xf32>
    %13 = tpu.matmul %11, %12, %cst_14 {dimension_numbers = #tpu.dot_dimension_numbers<[1], [0], [0], [1], [0, 0, 1, 1], [], []>} : vector<8x4xf32>, vector<4x128xf32>, vector<8x128xf32> -> vector<8x128xf32>
    %c1 = arith.constant 1 : index
    %c0_15 = arith.constant 0 : index
    %c0_16 = arith.constant 0 : index
    %14 = vector.load %arg2[%c1, %c0_15, %c0_16] : memref<9x8x4xf32, #tpu.memory_space<vmem>>, vector<1x8x4xf32>
    %15 = vector.shape_cast %14 : vector<1x8x4xf32> to vector<8x4xf32>
    %c0_17 = arith.constant 0 : index
    %c1_18 = arith.constant 1 : index
    %16 = vector.load %arg8[%c0_17, %c1_18] : memref<4x150xf32, #tpu.memory_space<vmem>>, vector<4x128xf32>
    %cst_19 = arith.constant dense<0.000000e+00> : vector<8x128xf32>
    %17 = tpu.matmul %15, %16, %cst_19 {dimension_numbers = #tpu.dot_dimension_numbers<[1], [0], [0], [1], [0, 0, 1, 1], [], []>} : vector<8x4xf32>, vector<4x128xf32>, vector<8x128xf32> -> vector<8x128xf32>
    %18 = arith.addf %13, %17 : vector<8x128xf32>
    %c2 = arith.constant 2 : index
    %c0_20 = arith.constant 0 : index
    %c0_21 = arith.constant 0 : index
    %19 = vector.load %arg2[%c2, %c0_20, %c0_21] : memref<9x8x4xf32, #tpu.memory_space<vmem>>, vector<1x8x4xf32>
    %20 = vector.shape_cast %19 : vector<1x8x4xf32> to vector<8x4xf32>
    %c0_22 = arith.constant 0 : index
    %c2_23 = arith.constant 2 : index
    %21 = vector.load %arg8[%c0_22, %c2_23] : memref<4x150xf32, #tpu.memory_space<vmem>>, vector<4x128xf32>
    %cst_24 = arith.constant dense<0.000000e+00> : vector<8x128xf32>
    %22 = tpu.matmul %20, %21, %cst_24 {dimension_numbers = #tpu.dot_dimension_numbers<[1], [0], [0], [1], [0, 0, 1, 1], [], []>} : vector<8x4xf32>, vector<4x128xf32>, vector<8x128xf32> -> vector<8x128xf32>
    %23 = arith.addf %18, %22 : vector<8x128xf32>
    %c3 = arith.constant 3 : index
    %c0_25 = arith.constant 0 : index
    %c0_26 = arith.constant 0 : index
    %24 = vector.load %arg2[%c3, %c0_25, %c0_26] : memref<9x8x4xf32, #tpu.memory_space<vmem>>, vector<1x8x4xf32>
    %25 = vector.shape_cast %24 : vector<1x8x4xf32> to vector<8x4xf32>
    %c0_27 = arith.constant 0 : index
    %c10 = arith.constant 10 : index
    %26 = vector.load %arg8[%c0_27, %c10] : memref<4x150xf32, #tpu.memory_space<vmem>>, vector<4x128xf32>
    %cst_28 = arith.constant dense<0.000000e+00> : vector<8x128xf32>
    %27 = tpu.matmul %25, %26, %cst_28 {dimension_numbers = #tpu.dot_dimension_numbers<[1], [0], [0], [1], [0, 0, 1, 1], [], []>} : vector<8x4xf32>, vector<4x128xf32>, vector<8x128xf32> -> vector<8x128xf32>
    %28 = arith.addf %23, %27 : vector<8x128xf32>
    %c4 = arith.constant 4 : index
    %c0_29 = arith.constant 0 : index
    %c0_30 = arith.constant 0 : index
    %29 = vector.load %arg2[%c4, %c0_29, %c0_30] : memref<9x8x4xf32, #tpu.memory_space<vmem>>, vector<1x8x4xf32>
    %30 = vector.shape_cast %29 : vector<1x8x4xf32> to vector<8x4xf32>
    %c0_31 = arith.constant 0 : index
    %c11_32 = arith.constant 11 : index
    %31 = vector.load %arg8[%c0_31, %c11_32] : memref<4x150xf32, #tpu.memory_space<vmem>>, vector<4x128xf32>
    %cst_33 = arith.constant dense<0.000000e+00> : vector<8x128xf32>
    %32 = tpu.matmul %30, %31, %cst_33 {dimension_numbers = #tpu.dot_dimension_numbers<[1], [0], [0], [1], [0, 0, 1, 1], [], []>} : vector<8x4xf32>, vector<4x128xf32>, vector<8x128xf32> -> vector<8x128xf32>
    %33 = arith.addf %28, %32 : vector<8x128xf32>
    %c5 = arith.constant 5 : index
    %c0_34 = arith.constant 0 : index
    %c0_35 = arith.constant 0 : index
    %34 = vector.load %arg2[%c5, %c0_34, %c0_35] : memref<9x8x4xf32, #tpu.memory_space<vmem>>, vector<1x8x4xf32>
    %35 = vector.shape_cast %34 : vector<1x8x4xf32> to vector<8x4xf32>
    %c0_36 = arith.constant 0 : index
    %c12 = arith.constant 12 : index
    %36 = vector.load %arg8[%c0_36, %c12] : memref<4x150xf32, #tpu.memory_space<vmem>>, vector<4x128xf32>
    %cst_37 = arith.constant dense<0.000000e+00> : vector<8x128xf32>
    %37 = tpu.matmul %35, %36, %cst_37 {dimension_numbers = #tpu.dot_dimension_numbers<[1], [0], [0], [1], [0, 0, 1, 1], [], []>} : vector<8x4xf32>, vector<4x128xf32>, vector<8x128xf32> -> vector<8x128xf32>
    %38 = arith.addf %33, %37 : vector<8x128xf32>
    %c6 = arith.constant 6 : index
    %c0_38 = arith.constant 0 : index
    %c0_39 = arith.constant 0 : index
    %39 = vector.load %arg2[%c6, %c0_38, %c0_39] : memref<9x8x4xf32, #tpu.memory_space<vmem>>, vector<1x8x4xf32>
    %40 = vector.shape_cast %39 : vector<1x8x4xf32> to vector<8x4xf32>
    %c0_40 = arith.constant 0 : index
    %c20 = arith.constant 20 : index
    %41 = vector.load %arg8[%c0_40, %c20] : memref<4x150xf32, #tpu.memory_space<vmem>>, vector<4x128xf32>
    %cst_41 = arith.constant dense<0.000000e+00> : vector<8x128xf32>
    %42 = tpu.matmul %40, %41, %cst_41 {dimension_numbers = #tpu.dot_dimension_numbers<[1], [0], [0], [1], [0, 0, 1, 1], [], []>} : vector<8x4xf32>, vector<4x128xf32>, vector<8x128xf32> -> vector<8x128xf32>
    %43 = arith.addf %38, %42 : vector<8x128xf32>
    %c7 = arith.constant 7 : index
    %c0_42 = arith.constant 0 : index
    %c0_43 = arith.constant 0 : index
    %44 = vector.load %arg2[%c7, %c0_42, %c0_43] : memref<9x8x4xf32, #tpu.memory_space<vmem>>, vector<1x8x4xf32>
    %45 = vector.shape_cast %44 : vector<1x8x4xf32> to vector<8x4xf32>
    %c0_44 = arith.constant 0 : index
    %c21 = arith.constant 21 : index
    %46 = vector.load %arg8[%c0_44, %c21] : memref<4x150xf32, #tpu.memory_space<vmem>>, vector<4x128xf32>
    %cst_45 = arith.constant dense<0.000000e+00> : vector<8x128xf32>
    %47 = tpu.matmul %45, %46, %cst_45 {dimension_numbers = #tpu.dot_dimension_numbers<[1], [0], [0], [1], [0, 0, 1, 1], [], []>} : vector<8x4xf32>, vector<4x128xf32>, vector<8x128xf32> -> vector<8x128xf32>
    %48 = arith.addf %43, %47 : vector<8x128xf32>
    %c8 = arith.constant 8 : index
    %c0_46 = arith.constant 0 : index
    %c0_47 = arith.constant 0 : index
    %49 = vector.load %arg2[%c8, %c0_46, %c0_47] : memref<9x8x4xf32, #tpu.memory_space<vmem>>, vector<1x8x4xf32>
    %50 = vector.shape_cast %49 : vector<1x8x4xf32> to vector<8x4xf32>
    %c0_48 = arith.constant 0 : index
    %c22 = arith.constant 22 : index
    %51 = vector.load %arg8[%c0_48, %c22] : memref<4x150xf32, #tpu.memory_space<vmem>>, vector<4x128xf32>
    %cst_49 = arith.constant dense<0.000000e+00> : vector<8x128xf32>
    %52 = tpu.matmul %50, %51, %cst_49 {dimension_numbers = #tpu.dot_dimension_numbers<[1], [0], [0], [1], [0, 0, 1, 1], [], []>} : vector<8x4xf32>, vector<4x128xf32>, vector<8x128xf32> -> vector<8x128xf32>
    %53 = arith.addf %48, %52 : vector<8x128xf32>
    %c0_50 = arith.constant 0 : index
    %c0_51 = arith.constant 0 : index
    %54 = vector.load %arg3[%c0_50, %c0_51] : memref<8x1xf32, #tpu.memory_space<vmem>>, vector<8x1xf32>
    %55 = vector.broadcast %54 : vector<8x1xf32> to vector<8x128xf32>
    %56 = arith.addf %53, %55 : vector<8x128xf32>
    %cst_52 = arith.constant 0.000000e+00 : f32
    %57 = vector.broadcast %cst_52 : f32 to vector<8x128xf32>
    %58 = arith.maximumf %56, %57 : vector<8x128xf32>
    %cst_53 = arith.constant 0.000000e+00 : f32
    %59 = vector.broadcast %cst_53 : f32 to vector<8x11xf32>
    %c0_54 = arith.constant 0 : index
    %c0_55 = arith.constant 0 : index
    %60 = vector.load %arg9[%c0_54, %c0_55] : memref<8x150xf32, #tpu.memory_space<vmem>>, vector<8x11xf32>
    tpu.vector_store %arg9[%c0_54, %c0_55], %59 {strides = array<i32>} : memref<8x150xf32, #tpu.memory_space<vmem>>, vector<8x11xf32>,
    %cst_56 = arith.constant 0.000000e+00 : f32
    %61 = vector.broadcast %cst_56 : f32 to vector<8x11xf32>
    %c0_57 = arith.constant 0 : index
    %c139_58 = arith.constant 139 : index
    %62 = vector.load %arg9[%c0_57, %c139_58] : memref<8x150xf32, #tpu.memory_space<vmem>>, vector<8x11xf32>
    tpu.vector_store %arg9[%c0_57, %c139_58], %61 {strides = array<i32>} : memref<8x150xf32, #tpu.memory_space<vmem>>, vector<8x11xf32>,
    %63 = vector.broadcast %0 : vector<1x128xf32> to vector<8x128xf32>
    %64 = arith.mulf %58, %63 : vector<8x128xf32>
    %c0_59 = arith.constant 0 : index
    %c11_60 = arith.constant 11 : index
    %65 = vector.load %arg9[%c0_59, %c11_60] : memref<8x150xf32, #tpu.memory_space<vmem>>, vector<8x128xf32>
    tpu.vector_store %arg9[%c0_59, %c11_60], %64 {strides = array<i32>} : memref<8x150xf32, #tpu.memory_space<vmem>>, vector<8x128xf32>,
    %c0_61 = arith.constant 0 : index
    %c0_62 = arith.constant 0 : index
    %c0_63 = arith.constant 0 : index
    %66 = vector.load %arg4[%c0_61, %c0_62, %c0_63] : memref<9x8x8xf32, #tpu.memory_space<vmem>>, vector<1x8x8xf32>
    %67 = vector.shape_cast %66 : vector<1x8x8xf32> to vector<8x8xf32>
    %c0_64 = arith.constant 0 : index
    %c0_65 = arith.constant 0 : index
    %68 = vector.load %arg9[%c0_64, %c0_65] : memref<8x150xf32, #tpu.memory_space<vmem>>, vector<8x128xf32>
    %cst_66 = arith.constant dense<0.000000e+00> : vector<8x128xf32>
    %69 = tpu.matmul %67, %68, %cst_66 {dimension_numbers = #tpu.dot_dimension_numbers<[1], [0], [0], [1], [0, 0, 1, 1], [], []>} : vector<8x8xf32>, vector<8x128xf32>, vector<8x128xf32> -> vector<8x128xf32>
    %c1_67 = arith.constant 1 : index
    %c0_68 = arith.constant 0 : index
    %c0_69 = arith.constant 0 : index
    %70 = vector.load %arg4[%c1_67, %c0_68, %c0_69] : memref<9x8x8xf32, #tpu.memory_space<vmem>>, vector<1x8x8xf32>
    %71 = vector.shape_cast %70 : vector<1x8x8xf32> to vector<8x8xf32>
    %c0_70 = arith.constant 0 : index
    %c1_71 = arith.constant 1 : index
    %72 = vector.load %arg9[%c0_70, %c1_71] : memref<8x150xf32, #tpu.memory_space<vmem>>, vector<8x128xf32>
    %cst_72 = arith.constant dense<0.000000e+00> : vector<8x128xf32>
    %73 = tpu.matmul %71, %72, %cst_72 {dimension_numbers = #tpu.dot_dimension_numbers<[1], [0], [0], [1], [0, 0, 1, 1], [], []>} : vector<8x8xf32>, vector<8x128xf32>, vector<8x128xf32> -> vector<8x128xf32>
    %74 = arith.addf %69, %73 : vector<8x128xf32>
    %c2_73 = arith.constant 2 : index
    %c0_74 = arith.constant 0 : index
    %c0_75 = arith.constant 0 : index
    %75 = vector.load %arg4[%c2_73, %c0_74, %c0_75] : memref<9x8x8xf32, #tpu.memory_space<vmem>>, vector<1x8x8xf32>
    %76 = vector.shape_cast %75 : vector<1x8x8xf32> to vector<8x8xf32>
    %c0_76 = arith.constant 0 : index
    %c2_77 = arith.constant 2 : index
    %77 = vector.load %arg9[%c0_76, %c2_77] : memref<8x150xf32, #tpu.memory_space<vmem>>, vector<8x128xf32>
    %cst_78 = arith.constant dense<0.000000e+00> : vector<8x128xf32>
    %78 = tpu.matmul %76, %77, %cst_78 {dimension_numbers = #tpu.dot_dimension_numbers<[1], [0], [0], [1], [0, 0, 1, 1], [], []>} : vector<8x8xf32>, vector<8x128xf32>, vector<8x128xf32> -> vector<8x128xf32>
    %79 = arith.addf %74, %78 : vector<8x128xf32>
    %c3_79 = arith.constant 3 : index
    %c0_80 = arith.constant 0 : index
    %c0_81 = arith.constant 0 : index
    %80 = vector.load %arg4[%c3_79, %c0_80, %c0_81] : memref<9x8x8xf32, #tpu.memory_space<vmem>>, vector<1x8x8xf32>
    %81 = vector.shape_cast %80 : vector<1x8x8xf32> to vector<8x8xf32>
    %c0_82 = arith.constant 0 : index
    %c10_83 = arith.constant 10 : index
    %82 = vector.load %arg9[%c0_82, %c10_83] : memref<8x150xf32, #tpu.memory_space<vmem>>, vector<8x128xf32>
    %cst_84 = arith.constant dense<0.000000e+00> : vector<8x128xf32>
    %83 = tpu.matmul %81, %82, %cst_84 {dimension_numbers = #tpu.dot_dimension_numbers<[1], [0], [0], [1], [0, 0, 1, 1], [], []>} : vector<8x8xf32>, vector<8x128xf32>, vector<8x128xf32> -> vector<8x128xf32>
    %84 = arith.addf %79, %83 : vector<8x128xf32>
    %c4_85 = arith.constant 4 : index
    %c0_86 = arith.constant 0 : index
    %c0_87 = arith.constant 0 : index
    %85 = vector.load %arg4[%c4_85, %c0_86, %c0_87] : memref<9x8x8xf32, #tpu.memory_space<vmem>>, vector<1x8x8xf32>
    %86 = vector.shape_cast %85 : vector<1x8x8xf32> to vector<8x8xf32>
    %c0_88 = arith.constant 0 : index
    %c11_89 = arith.constant 11 : index
    %87 = vector.load %arg9[%c0_88, %c11_89] : memref<8x150xf32, #tpu.memory_space<vmem>>, vector<8x128xf32>
    %cst_90 = arith.constant dense<0.000000e+00> : vector<8x128xf32>
    %88 = tpu.matmul %86, %87, %cst_90 {dimension_numbers = #tpu.dot_dimension_numbers<[1], [0], [0], [1], [0, 0, 1, 1], [], []>} : vector<8x8xf32>, vector<8x128xf32>, vector<8x128xf32> -> vector<8x128xf32>
    %89 = arith.addf %84, %88 : vector<8x128xf32>
    %c5_91 = arith.constant 5 : index
    %c0_92 = arith.constant 0 : index
    %c0_93 = arith.constant 0 : index
    %90 = vector.load %arg4[%c5_91, %c0_92, %c0_93] : memref<9x8x8xf32, #tpu.memory_space<vmem>>, vector<1x8x8xf32>
    %91 = vector.shape_cast %90 : vector<1x8x8xf32> to vector<8x8xf32>
    %c0_94 = arith.constant 0 : index
    %c12_95 = arith.constant 12 : index
    %92 = vector.load %arg9[%c0_94, %c12_95] : memref<8x150xf32, #tpu.memory_space<vmem>>, vector<8x128xf32>
    %cst_96 = arith.constant dense<0.000000e+00> : vector<8x128xf32>
    %93 = tpu.matmul %91, %92, %cst_96 {dimension_numbers = #tpu.dot_dimension_numbers<[1], [0], [0], [1], [0, 0, 1, 1], [], []>} : vector<8x8xf32>, vector<8x128xf32>, vector<8x128xf32> -> vector<8x128xf32>
    %94 = arith.addf %89, %93 : vector<8x128xf32>
    %c6_97 = arith.constant 6 : index
    %c0_98 = arith.constant 0 : index
    %c0_99 = arith.constant 0 : index
    %95 = vector.load %arg4[%c6_97, %c0_98, %c0_99] : memref<9x8x8xf32, #tpu.memory_space<vmem>>, vector<1x8x8xf32>
    %96 = vector.shape_cast %95 : vector<1x8x8xf32> to vector<8x8xf32>
    %c0_100 = arith.constant 0 : index
    %c20_101 = arith.constant 20 : index
    %97 = vector.load %arg9[%c0_100, %c20_101] : memref<8x150xf32, #tpu.memory_space<vmem>>, vector<8x128xf32>
    %cst_102 = arith.constant dense<0.000000e+00> : vector<8x128xf32>
    %98 = tpu.matmul %96, %97, %cst_102 {dimension_numbers = #tpu.dot_dimension_numbers<[1], [0], [0], [1], [0, 0, 1, 1], [], []>} : vector<8x8xf32>, vector<8x128xf32>, vector<8x128xf32> -> vector<8x128xf32>
    %99 = arith.addf %94, %98 : vector<8x128xf32>
    %c7_103 = arith.constant 7 : index
    %c0_104 = arith.constant 0 : index
    %c0_105 = arith.constant 0 : index
    %100 = vector.load %arg4[%c7_103, %c0_104, %c0_105] : memref<9x8x8xf32, #tpu.memory_space<vmem>>, vector<1x8x8xf32>
    %101 = vector.shape_cast %100 : vector<1x8x8xf32> to vector<8x8xf32>
    %c0_106 = arith.constant 0 : index
    %c21_107 = arith.constant 21 : index
    %102 = vector.load %arg9[%c0_106, %c21_107] : memref<8x150xf32, #tpu.memory_space<vmem>>, vector<8x128xf32>
    %cst_108 = arith.constant dense<0.000000e+00> : vector<8x128xf32>
    %103 = tpu.matmul %101, %102, %cst_108 {dimension_numbers = #tpu.dot_dimension_numbers<[1], [0], [0], [1], [0, 0, 1, 1], [], []>} : vector<8x8xf32>, vector<8x128xf32>, vector<8x128xf32> -> vector<8x128xf32>
    %104 = arith.addf %99, %103 : vector<8x128xf32>
    %c8_109 = arith.constant 8 : index
    %c0_110 = arith.constant 0 : index
    %c0_111 = arith.constant 0 : index
    %105 = vector.load %arg4[%c8_109, %c0_110, %c0_111] : memref<9x8x8xf32, #tpu.memory_space<vmem>>, vector<1x8x8xf32>
    %106 = vector.shape_cast %105 : vector<1x8x8xf32> to vector<8x8xf32>
    %c0_112 = arith.constant 0 : index
    %c22_113 = arith.constant 22 : index
    %107 = vector.load %arg9[%c0_112, %c22_113] : memref<8x150xf32, #tpu.memory_space<vmem>>, vector<8x128xf32>
    %cst_114 = arith.constant dense<0.000000e+00> : vector<8x128xf32>
    %108 = tpu.matmul %106, %107, %cst_114 {dimension_numbers = #tpu.dot_dimension_numbers<[1], [0], [0], [1], [0, 0, 1, 1], [], []>} : vector<8x8xf32>, vector<8x128xf32>, vector<8x128xf32> -> vector<8x128xf32>
    %109 = arith.addf %104, %108 : vector<8x128xf32>
    %c0_115 = arith.constant 0 : index
    %c0_116 = arith.constant 0 : index
    %110 = vector.load %arg5[%c0_115, %c0_116] : memref<8x1xf32, #tpu.memory_space<vmem>>, vector<8x1xf32>
    %111 = vector.broadcast %110 : vector<8x1xf32> to vector<8x128xf32>
    %112 = arith.addf %109, %111 : vector<8x128xf32>
    %cst_117 = arith.constant 0.000000e+00 : f32
    %113 = vector.broadcast %cst_117 : f32 to vector<8x128xf32>
    %114 = arith.maximumf %112, %113 : vector<8x128xf32>
    %c0_118 = arith.constant 0 : index
    %c0_119 = arith.constant 0 : index
    %c0_120 = arith.constant 0 : index
    %115 = vector.load %arg7[%c0_118, %c0_119, %c0_120] : memref<1x8x128xf32, #tpu.memory_space<vmem>>, vector<1x8x128xf32>
    %116 = vector.shape_cast %115 : vector<1x8x128xf32> to vector<8x128xf32>
    %117 = vector.shape_cast %114 : vector<8x128xf32> to vector<1x8x128xf32>
    tpu.vector_store %arg7[%c0_118, %c0_119, %c0_120], %117 {strides = array<i32>} : memref<1x8x128xf32, #tpu.memory_space<vmem>>, vector<1x8x128xf32>,
    return
  }
  func.func @transform_0(%arg0: i32) -> (i32, i32, i32) {
    %c0_i32 = arith.constant 0 : i32
    %c0_i32_0 = arith.constant 0 : i32
    %c0_i32_1 = arith.constant 0 : i32
    return %arg0, %c0_i32, %c0_i32_0 : i32, i32, i32
  }
  func.func @transform_1(%arg0: i32) -> (i32, i32, i32) {
    %c0_i32 = arith.constant 0 : i32
    %c0_i32_0 = arith.constant 0 : i32
    %c0_i32_1 = arith.constant 0 : i32
    %c0_i32_2 = arith.constant 0 : i32
    return %c0_i32, %c0_i32_0, %c0_i32_1 : i32, i32, i32
  }
  func.func @transform_2(%arg0: i32) -> (i32, i32) {
    %c0_i32 = arith.constant 0 : i32
    %c0_i32_0 = arith.constant 0 : i32
    %c0_i32_1 = arith.constant 0 : i32
    return %c0_i32, %c0_i32_0 : i32, i32
  }
  func.func @transform_3(%arg0: i32) -> (i32, i32, i32) {
    %c0_i32 = arith.constant 0 : i32
    %c0_i32_0 = arith.constant 0 : i32
    %c0_i32_1 = arith.constant 0 : i32
    %c0_i32_2 = arith.constant 0 : i32
    return %c0_i32, %c0_i32_0, %c0_i32_1 : i32, i32, i32
  }
  func.func @transform_4(%arg0: i32) -> (i32, i32) {
    %c0_i32 = arith.constant 0 : i32
    %c0_i32_0 = arith.constant 0 : i32
    %c0_i32_1 = arith.constant 0 : i32
    return %c0_i32, %c0_i32_0 : i32, i32
  }
  func.func @transform_5(%arg0: i32) -> (i32, i32) {
    %c0_i32 = arith.constant 0 : i32
    %c0_i32_0 = arith.constant 0 : i32
    %c0_i32_1 = arith.constant 0 : i32
    return %c0_i32, %c0_i32_0 : i32, i32
  }
  func.func @transform_6(%arg0: i32) -> (i32, i32, i32) {
    %c0_i32 = arith.constant 0 : i32
    %c0_i32_0 = arith.constant 0 : i32
    %c0_i32_1 = arith.constant 0 : i32
    return %arg0, %c0_i32, %c0_i32_0 : i32, i32, i32
  }
}

</mosaic_0001>

<bundles_post_ra>
// kernel: down_block_forward.1
= control target key start
LH: loop header
LB: loop body
LE: loop exit
PB: predicated region body
PF: predicated region fallthrough
CT: control target
= control target key end

     0   :  { %s2118_s21 = smov 0   ;;  %s2344_s0 = inlined_call_operand.vmem [shape: f32[2,4,128], index: 0, kind: input, shape index: {}]   ;;  %s2345_s1 = inlined_call_operand.vmem [shape: f32[9,8,4], index: 1, kind: input, shape index: {}]   ;;  %s2346_s2 = inlined_call_operand.vmem [shape: f32[8,1], index: 2, kind: input, shape index: {}]   ;;  %s2347_s3 = inlined_call_operand.vmem [shape: f32[9,8,8], index: 3, kind: input, shape index: {}]   ;;  %s2348_s4 = inlined_call_operand.vmem [shape: f32[8,1], index: 4, kind: input, shape index: {}]   ;;  %s2349_s5 = inlined_call_operand.vmem [shape: f32[1,128], index: 5, kind: input, shape index: {}]   ;;  %s2350_s6 = inlined_call_operand.vmem [shape: f32[2,8,128], index: 6, kind: output, shape index: {}]  }
   0x1 LB: > { %s1861_s22 = sadd.s32 4294967295, %s2069_s21   ;;  %p1865_p0 = scmp.ge.s32.totalorder %s2069_s21, 1  ;;  %s2069_s21 = sphi %s2118_s21, %s16_s21  }
   0x2   : > { %p211_p1 = scmp.lt.s32.totalorder %s2069_s21, 3 }
   0x4   : > { %p212_p2 = pnand %p1865_p0, %p211_p1 }
   0x5   : > { %p239_p3 = scmp.lt.s32.totalorder (!%p212_p2), %s1861_s22, 1  ;;  %vm249_vm0 = vcmask (!%p212_p2), 84992   ;;  %v2071_v0 = vmov (!%p212_p2), 0.0   ;;  %vm251_vm1 = vcmask (!%p212_p2), 175192   ;;  %vm264_vm2 = vcmask (!%p212_p2), 89088   ;;  %s2072_s29 = smov (!%p212_p2), 11  }
   0x6   : > { %215 = sbr.rel (%p212_p2) target bundleno = 998 (0x3e6), region = 44  ;;  %250 = vst.msk [vmem:[#allocation2] sm:$0xf] (!%p212_p2), %vm249_vm0, %v2071_v0  ;;  %1955 = vmatprep.subr.mxu1 (!%p212_p2), %v2071_v0  ;;  %1950 = vmatprep.subr.mxu0 (!%p212_p2), %v2071_v0  ;;  %v2138_v1 = vld [vmem:[%s2349_s5] ss:$0 sm:$0xff] (!%p212_p2)  ;;  %vm267_vm3 = vcmask (!%p212_p2), 1043544  }
   0x7   : > { %252 = vst.msk [vmem:[#allocation2 + $0x4] sm:$0xf] (!%p212_p2), %vm251_vm1, %v2071_v0  ;;  %vm268_vm4 = vcmask (!%p212_p2), 89092   ;;  %vm2073_vm6 = vmmov (!%p212_p2), 0   ;;  %vm288_vm7 = vcmask (!%p212_p2), 1043456   ;;  %v271_v9 = vld [vmem:[%s2345_s1] sm:$0xff] (!%p212_p2) }
   0x8   : > { %1054 = vst.msk [vmem:[#allocation3] sm:$0xff] (!%p212_p2), %vm264_vm2, %v2071_v0  ;;  %vm269_vm5 = vmor (!%p212_p2), %vm268_vm4, %vm267_vm3  ;;  %1957 = vmatprep.mubr.msk.f32.mxu1 (!%p212_p2), %vm2073_vm6, %v2071_v0  ;;  %1952 = vmatprep.mubr.msk.f32.mxu0 (!%p212_p2), %vm2073_vm6, %v2071_v0  ;;  %vm284_vm8 = vcmask (!%p212_p2), 31744   ;;  %s2074_s8 = smov (!%p212_p2), 126   ;;  %s2075_s9 = smov (!%p212_p2), 127   ;;  %v2079_v11 = vmov (!%p212_p2), 0   ;;  %v1046_v12 = vld [vmem:[%s2346_s2] sm:$0xff] (!%p212_p2) }
   0x9   : > { %s2076_s10 = smov (!%p212_p2), 118   ;;  %s2077_s11 = smov (!%p212_p2), 117   ;;  %2060 = vset.pattern.permute.xlu1 (!%p212_p2), %v2079_v11  ;;  %2061 = vset.pattern.permute.xlu0 (!%p212_p2), %v2079_v11  ;;  %vm533_vm9 = vcmask (!%p212_p2), 965632   ;;  %v1877_v19 = vld [vmem:[%s2345_s1 + $0x18] sm:$0xff] (!%p212_p2)  ;;  %vm282_vm10 = vcmask (!%p212_p2), 1039360   ;;  %vm446_vm11 = vcmask (!%p212_p2), 1031168  }
   0xa   : > { %s2078_s12 = smov (!%p212_p2), 116   ;;  %s2080_s13 = smov (!%p212_p2), 108   ;;  %v1869_v23 = vld [vmem:[%s2345_s1 + $0x8] sm:$0xff] (!%p212_p2)  ;;  %vm707_vm12 = vcmask (!%p212_p2), 949248   ;;  %vm620_vm13 = vcmask (!%p212_p2), 957440   ;;  %v1874_v28 = vld [vmem:[%s2345_s1 + $0x10] sm:$0xff] (!%p212_p2) }
   0xb   : > { %s2081_s14 = smov (!%p212_p2), 107   ;;  %s2082_s15 = smov (!%p212_p2), 106   ;;  %v1883_v29 = vld [vmem:[%s2345_s1 + $0x28] sm:$0xff] (!%p212_p2)  ;;  %vm794_vm14 = vcmask (!%p212_p2), 883712   ;;  %v1880_v34 = vld [vmem:[%s2345_s1 + $0x20] sm:$0xff] (!%p212_p2)  ;;  %vm881_vm15 = vcmask (!%p212_p2), 875520  }
   0xc   : > { %v1886_v38 = vld [vmem:[%s2345_s1 + $0x30] sm:$0xff] (!%p212_p2)  ;;  %v1889_v39 = vld [vmem:[%s2345_s1 + $0x38] sm:$0xff] (!%p212_p2)  ;;  %vm968_vm0 = vcmask (!%p212_p2), 867328   ;;  %v1892_v43 = vld [vmem:[%s2345_s1 + $0x40] sm:$0xff] (!%p212_p2)  ;;  %vm1055_vm1 = vcmask (!%p212_p2), 179288   ;;  %vm1062_vm3 = vcmask (!%p212_p2), 1047640  }
   0xd   : > { %s2352_s22 = smov (!%p239_p3, %s1861_s22), 1  ;;  %1056 = vst.msk [vmem:[#allocation3 + $0x8] sm:$0xff] %vm1055_vm1, %v2071_v0  ;;  %vm1078_vm4 = vcmask 64512  }
   0xe   : > { %s1866_s23 = sshll.u32 %s2352_s22, 2  ;;  %s1867_s19 = sshll.u32 %s2352_s22, 3 }
   0xf   : > { %s242_s28 = scalar_lea.vmem %s2344_s0, %s1866_s23  ;;  %s246_s24 = scalar_lea.vmem %s2350_s6, %s1867_s19 }
  0x10   : > { %v248_v2 = vld [vmem:[%s242_s28] sm:$0xf] }
  0x11   : > { %v259_v3 = vmul.f32 %v2138_v1, %v248_v2 }
  0x13   : > { %261 = vrot.lane.b32.xlu0 %v259_v3, %s2072_s29 }
  0x85   : > { %v262_v4 = vpop.permute.xlu0 %261 }
  0x86   : > { %v263_v5 = vrot.slane %v262_v4, 4 }
  0x88   : > { %v265_v6 = vsel %vm264_vm2, %v263_v5, %v262_v4 }
  0x89   : > { %270 = vst.msk [vmem:[#allocation2] sm:$0xff] %vm269_vm5, %v265_v6 }
  0x90   : > { %v439_v7 = vld [vmem:[#allocation2] sm:$0xff] }
  0x91   : > { %v272_v8 = vld [vmem:[#allocation2] sm:$0xf]  ;;  %442 = vrot.lane.b32.xlu1 %v439_v7, %s2074_s8  ;;  %278 = vrot.lane.b32.xlu0 %v439_v7, %s2075_s9  ;;  %v441_v10 = vcombine.high %v439_v7, %v439_v7 }
  0x92   : > { %1956 = vmatpush3.msk.msra.mxu1 %vm288_vm7, %v272_v8 }
  0x93   : > { %1965 = vmatprep.subr.mxu1 %v2071_v0  ;;  %1958 = vmatmul.mubr.msk.f32.vlgmr.msra.gmra.mrb[0].mxu1 %vm284_vm8, %v271_v9 }
  0x94   : > { %1967 = vmatprep.mubr.msk.f32.mxu1 %vm2073_vm6, %v2071_v0 }
  0x95   : > { %529 = vrot.lane.b32.xlu1 %v439_v7, %s2076_s10  ;;  %444 = vrot.lane.b32.xlu0 %v441_v10, %s2074_s8 }
  0x99   : > { %616 = vrot.lane.b32.xlu1 %v439_v7, %s2077_s11  ;;  %531 = vrot.lane.b32.xlu0 %v441_v10, %s2076_s10 }
  0x9d   : > { %618 = vrot.lane.b32.xlu0 %v441_v10, %s2077_s11  ;;  %280 = vrot.lane.b32.xlu1 %v441_v10, %s2075_s9 }
  0xa1   : > { %705 = vrot.lane.b32.xlu0 %v441_v10, %s2078_s12  ;;  %703 = vrot.lane.b32.xlu1 %v439_v7, %s2078_s12 }
  0xa5   : > { %792 = vrot.lane.b32.xlu0 %v441_v10, %s2080_s13  ;;  %790 = vrot.lane.b32.xlu1 %v439_v7, %s2080_s13 }
  0xa9   : > { %879 = vrot.lane.b32.xlu0 %v441_v10, %s2081_s14  ;;  %877 = vrot.lane.b32.xlu1 %v439_v7, %s2081_s14 }
  0xad   : > { %966 = vrot.lane.b32.xlu0 %v441_v10, %s2082_s15  ;;  %964 = vrot.lane.b32.xlu1 %v439_v7, %s2082_s15 }
  0xb1   : > { %1049 = vperm.xlu1 %2060, %v1046_v12  }
 0x103   : > { %v443_v13 = vpop.permute.xlu1 %442  ;;  %v279_v14 = vpop.permute.xlu0 %278 }
 0x107   : > { %v530_v15 = vpop.permute.xlu1 %529  ;;  %v445_v16 = vpop.permute.xlu0 %444 }
 0x108   : > { %v447_v25 = vsel %vm446_vm11, %v443_v13, %v445_v16  ;;  %v1065_v16 = vld [vmem:[%s2347_s3] sm:$0xff] }
 0x10b   : > { %v617_v17 = vpop.permute.xlu1 %616  ;;  %v532_v18 = vpop.permute.xlu0 %531 }
 0x10c   : > { %v534_v20 = vsel %vm533_vm9, %v530_v15, %v532_v18 }
 0x10d   : > { %1966 = vmatpush3.msk.msra.mxu1 %vm288_vm7, %v534_v20 }
 0x10e   : > { %1975 = vmatprep.subr.mxu1 %v2071_v0  ;;  %1968 = vmatmul.mubr.msk.f32.vlgmr.msra.gmra.mrb[2].mxu1 %vm284_vm8, %v1877_v19  ;;  %v1895_v19 = vld [vmem:[%s2347_s3 + $0x8] sm:$0xff] }
 0x10f   : > { %v619_v21 = vpop.permute.xlu0 %618  ;;  %v281_v22 = vpop.permute.xlu1 %280  ;;  %1977 = vmatprep.mubr.msk.f32.mxu1 %vm2073_vm6, %v2071_v0 }
 0x110   : > { %v283_v24 = vsel %vm282_vm10, %v279_v14, %v281_v22  ;;  %v621_v31 = vsel %vm620_vm13, %v617_v17, %v619_v21 }
 0x111   : > { %1951 = vmatpush3.msk.msra.mxu0 %vm288_vm7, %v283_v24 }
 0x112   : > { %1953 = vmatmul.mubr.msk.f32.vlgmr.msra.gmra.mrb[0].mxu0 %vm284_vm8, %v1869_v23  ;;  %1960 = vmatprep.subr.mxu0 %v2071_v0  ;;  %v1898_v23 = vld [vmem:[%s2347_s3 + $0x10] sm:$0xff] }
 0x113   : > { %v706_v26 = vpop.permute.xlu0 %705  ;;  %1961 = vmatpush3.msk.msra.mxu0 %vm288_vm7, %v447_v25  ;;  %v704_v27 = vpop.permute.xlu1 %703  ;;  %1962 = vmatprep.mubr.msk.f32.mxu0 %vm2073_vm6, %v2071_v0 }
 0x114   : > { %v708_v30 = vsel %vm707_vm12, %v704_v27, %v706_v26  ;;  %1970 = vmatprep.subr.mxu0 %v2071_v0  ;;  %v1900_v27 = vld [vmem:[%s2347_s3 + $0x18] sm:$0xff] }
 0x115   : > { %1976 = vmatpush3.msk.msra.mxu1 %vm288_vm7, %v708_v30 }
 0x116   : > { %1963 = vmatmul.mubr.msk.f32.vlgmr.msra.gmra.mrb[2].mxu0 %vm284_vm8, %v1874_v28  ;;  %1978 = vmatmul.mubr.msk.f32.vlgmr.msra.gmra.mrb[4].mxu1 %vm284_vm8, %v1883_v29 }
 0x117   : > { %1971 = vmatpush3.msk.msra.mxu0 %vm288_vm7, %v621_v31  ;;  %v793_v32 = vpop.permute.xlu0 %792  ;;  %v791_v33 = vpop.permute.xlu1 %790  ;;  %1972 = vmatprep.mubr.msk.f32.mxu0 %vm2073_vm6, %v2071_v0  ;;  %v1902_v31 = vld [vmem:[%s2347_s3 + $0x20] sm:$0xff] }
 0x118   : > { %v795_v35 = vsel %vm794_vm14, %v791_v33, %v793_v32  ;;  %1980 = vmatprep.subr.mxu0 %v2071_v0  ;;  %1985 = vmatprep.subr.mxu1 %v2071_v0 }
 0x119   : > { %1987 = vmatprep.mubr.msk.f32.mxu1 %vm2073_vm6, %v2071_v0 }
 0x11a   : > { %1973 = vmatmul.mubr.msk.f32.vlgmr.msra.gmra.mrb[4].mxu0 %vm284_vm8, %v1880_v34 }
 0x11b   : > { %1981 = vmatpush3.msk.msra.mxu0 %vm288_vm7, %v795_v35  ;;  %v880_v36 = vpop.permute.xlu0 %879  ;;  %v878_v37 = vpop.permute.xlu1 %877  ;;  %1982 = vmatprep.mubr.msk.f32.mxu0 %vm2073_vm6, %v2071_v0  ;;  %v1904_v35 = vld [vmem:[%s2347_s3 + $0x28] sm:$0xff] }
 0x11c   : > { %v882_v40 = vsel %vm881_vm15, %v878_v37, %v880_v36  ;;  %1990 = vmatprep.subr.mxu0 %v2071_v0 }
 0x11d   : > { %1986 = vmatpush3.msk.msra.mxu1 %vm288_vm7, %v882_v40 }
 0x11e   : > { %1983 = vmatmul.mubr.msk.f32.vlgmr.msra.gmra.mrb[6].mxu0 %vm284_vm8, %v1886_v38  ;;  %1988 = vmatmul.mubr.msk.f32.vlgmr.msra.gmra.mrb[6].mxu1 %vm284_vm8, %v1889_v39  ;;  %v1906_v39 = vld [vmem:[%s2347_s3 + $0x30] sm:$0xff] }
 0x11f   : > { %v967_v41 = vpop.permute.xlu0 %966  ;;  %v965_v42 = vpop.permute.xlu1 %964  ;;  %1992 = vmatprep.mubr.msk.f32.mxu0 %vm2073_vm6, %v2071_v0  ;;  %1995 = vmatprep.subr.mxu1 %v2071_v0 }
 0x120   : > { %v969_v44 = vsel %vm968_vm0, %v965_v42, %v967_v41  ;;  %1997 = vmatprep.mubr.msk.f32.mxu1 %vm2073_vm6, %v2071_v0 }
 0x121   : > { %1991 = vmatpush3.msk.msra.mxu0 %vm288_vm7, %v969_v44 }
 0x122   : > { %1993 = vmatmul.mubr.msk.f32.vlgmr.msra.gmra.mrb[8].mxu0 %vm284_vm8, %v1892_v43  ;;  %2000 = vmatprep.subr.mxu0 %v2071_v0  ;;  %v1908_v43 = vld [vmem:[%s2347_s3 + $0x38] sm:$0xff] }
 0x123   : > { %2002 = vmatprep.mubr.msk.f32.mxu0 %vm2073_vm6, %v2071_v0 }
 0x130   : > { %v1050_v7 = vpop.permute.xlu1 %1049 }
 0x166   : > { %v433_v45 = vpop.f32.mrb[0].mxu1 }
 0x167   : > { %v1959_v46 = vpop.f32.mrb[1].mxu1 }
 0x1e1   : > { %v606_v47 = vpop.f32.mrb[2].mxu1 }
 0x1e2   : > { %v1969_v48 = vpop.f32.mrb[3].mxu1 }
 0x1e5   : > { %v357_v49 = vpop.f32.mrb[0].mxu0 }
 0x1e6   : > { %v434_v50 = vadd.f32 %v433_v45, %v357_v49  ;;  %v1954_v51 = vpop.f32.mrb[1].mxu0 }
 0x1e9   : > { %v519_v52 = vpop.f32.mrb[2].mxu0  ;;  %v780_v53 = vpop.f32.mrb[4].mxu1 }
 0x1ea   : > { %v523_v54 = vadd.f32 %v519_v52, %v434_v50  ;;  %v1964_v55 = vpop.f32.mrb[3].mxu0  ;;  %v1979_v56 = vpop.f32.mrb[5].mxu1 }
 0x1ec   : > { %v610_v57 = vadd.f32 %v606_v47, %v523_v54  ;;  %v1910_v47 = vld [vmem:[%s2347_s3 + $0x40] sm:$0xff] }
 0x1ed   : > { %v693_v58 = vpop.f32.mrb[4].mxu0 }
 0x1ee   : > { %v697_v59 = vadd.f32 %v693_v58, %v610_v57  ;;  %v1974_v60 = vpop.f32.mrb[5].mxu0 }
 0x1f0   : > { %v784_v61 = vadd.f32 %v780_v53, %v697_v59 }
 0x1f1   : > { %v867_v62 = vpop.f32.mrb[6].mxu0  ;;  %v954_v63 = vpop.f32.mrb[6].mxu1 }
 0x1f2   : > { %v871_v2 = vadd.f32 %v867_v62, %v784_v61  ;;  %v1984_v3 = vpop.f32.mrb[7].mxu0  ;;  %v1989_v4 = vpop.f32.mrb[7].mxu1 }
 0x1f4   : > { %v958_v5 = vadd.f32 %v954_v63, %v871_v2 }
 0x1f5   : > { %v1041_v6 = vpop.f32.mrb[8].mxu0 }
 0x1f6   : > { %v1045_v8 = vadd.f32 %v1041_v6, %v958_v5  ;;  %v1994_v9 = vpop.f32.mrb[9].mxu0 }
 0x1f8   : > { %v1052_v10 = vadd.f32 %v1050_v7, %v1045_v8 }
 0x1fa   : > { %v1053_v11 = vmax.f32 %v1052_v10, 0.0 }
 0x1fc   : > { %v1057_v12 = vmul.f32 %v2138_v1, %v1053_v11  ;;  %v1799_v1 = vld [vmem:[%s2348_s4] sm:$0xff] }
 0x1fe   : > { %1059 = vrot.lane.b32.xlu0 %v1057_v12, %s2072_s29 }
 0x270   : > { %v1060_v13 = vpop.permute.xlu0 %1059 }
 0x271   : > { %1063 = vst.msk [vmem:[#allocation3] sm:$0xff] %vm1062_vm3, %v1060_v13 }
 0x272   : > { %1064 = vst.msk [vmem:[#allocation3 + $0x8] sm:$0xff] %vm264_vm2, %v1060_v13 }
 0x278   : > { %v1066_v15 = vld [vmem:[#allocation3] sm:$0xff] }
 0x279   : > { %v1069_v14 = vld [vmem:[#allocation3 + $0x8] sm:$0xff]  ;;  %1072 = vrot.lane.b32.xlu1 %v1066_v15, %s2075_s9  ;;  %2001 = vmatpush3.msra.mxu0 %v1066_v15 }
 0x27a   : > { %1074 = vrot.lane.b32.xlu0 %v1069_v14, %s2075_s9  ;;  %2010 = vmatprep.subr.mxu0 %v2071_v0 }
 0x27b   : > { %2003 = vmatmul.mubr.msk.f32.vlgmr.msra.gmra.mrb[10].mxu0 %vm1078_vm4, %v1065_v16 }
 0x27c   : > { %2012 = vmatprep.mubr.msk.f32.mxu0 %vm2073_vm6, %v2071_v0 }
 0x27d   : > { %1227 = vrot.lane.b32.xlu1 %v1066_v15, %s2074_s8 }
 0x27e   : > { %1229 = vrot.lane.b32.xlu0 %v1069_v14, %s2074_s8 }
 0x281   : > { %1309 = vrot.lane.b32.xlu1 %v1066_v15, %s2076_s10 }
 0x282   : > { %1311 = vrot.lane.b32.xlu0 %v1069_v14, %s2076_s10 }
 0x285   : > { %1391 = vrot.lane.b32.xlu1 %v1066_v15, %s2077_s11 }
 0x286   : > { %1393 = vrot.lane.b32.xlu0 %v1069_v14, %s2077_s11 }
 0x289   : > { %1473 = vrot.lane.b32.xlu1 %v1066_v15, %s2078_s12 }
 0x28a   : > { %1475 = vrot.lane.b32.xlu0 %v1069_v14, %s2078_s12 }
 0x28d   : > { %1555 = vrot.lane.b32.xlu1 %v1066_v15, %s2080_s13 }
 0x28e   : > { %1557 = vrot.lane.b32.xlu0 %v1069_v14, %s2080_s13 }
 0x291   : > { %1637 = vrot.lane.b32.xlu1 %v1066_v15, %s2081_s14 }
 0x292   : > { %1639 = vrot.lane.b32.xlu0 %v1069_v14, %s2081_s14 }
 0x295   : > { %1719 = vrot.lane.b32.xlu1 %v1066_v15, %s2082_s15 }
 0x296   : > { %1721 = vrot.lane.b32.xlu0 %v1069_v14, %s2082_s15 }
 0x299   : > { %1802 = vperm.xlu1 %2060, %v1799_v1  }
 0x2eb   : > { %v1073_v18 = vpop.permute.xlu1 %1072 }
 0x2ec   : > { %v1075_v17 = vpop.permute.xlu0 %1074 }
 0x2ed   : > { %v1076_v20 = vsel %vm282_vm10, %v1073_v18, %v1075_v17 }
 0x2ee   : > { %1996 = vmatpush3.msra.mxu1 %v1076_v20 }
 0x2ef   : > { %2005 = vmatprep.subr.mxu1 %v2071_v0  ;;  %1998 = vmatmul.mubr.msk.f32.vlgmr.msra.gmra.mrb[8].mxu1 %vm1078_vm4, %v1895_v19  ;;  %v1228_v22 = vpop.permute.xlu1 %1227 }
 0x2f0   : > { %v1230_v21 = vpop.permute.xlu0 %1229  ;;  %2007 = vmatprep.mubr.msk.f32.mxu1 %vm2073_vm6, %v2071_v0 }
 0x2f1   : > { %v1231_v24 = vsel %vm446_vm11, %v1228_v22, %v1230_v21 }
 0x2f2   : > { %2006 = vmatpush3.msra.mxu1 %v1231_v24 }
 0x2f3   : > { %2015 = vmatprep.subr.mxu1 %v2071_v0  ;;  %2008 = vmatmul.mubr.msk.f32.vlgmr.msra.gmra.mrb[10].mxu1 %vm1078_vm4, %v1898_v23  ;;  %v1310_v26 = vpop.permute.xlu1 %1309 }
 0x2f4   : > { %v1312_v25 = vpop.permute.xlu0 %1311  ;;  %2017 = vmatprep.mubr.msk.f32.mxu1 %vm2073_vm6, %v2071_v0 }
 0x2f5   : > { %v1313_v28 = vsel %vm533_vm9, %v1310_v26, %v1312_v25 }
 0x2f6   : > { %2011 = vmatpush3.msra.mxu0 %v1313_v28 }
 0x2f7   : > { %2020 = vmatprep.subr.mxu0 %v2071_v0  ;;  %2013 = vmatmul.mubr.msk.f32.vlgmr.msra.gmra.mrb[12].mxu0 %vm1078_vm4, %v1900_v27  ;;  %v1392_v30 = vpop.permute.xlu1 %1391 }
 0x2f8   : > { %v1394_v29 = vpop.permute.xlu0 %1393  ;;  %2022 = vmatprep.mubr.msk.f32.mxu0 %vm2073_vm6, %v2071_v0 }
 0x2f9   : > { %v1395_v32 = vsel %vm620_vm13, %v1392_v30, %v1394_v29 }
 0x2fa   : > { %2016 = vmatpush3.msra.mxu1 %v1395_v32 }
 0x2fb   : > { %2025 = vmatprep.subr.mxu1 %v2071_v0  ;;  %2018 = vmatmul.mubr.msk.f32.vlgmr.msra.gmra.mrb[12].mxu1 %vm1078_vm4, %v1902_v31  ;;  %v1474_v34 = vpop.permute.xlu1 %1473 }
 0x2fc   : > { %v1476_v33 = vpop.permute.xlu0 %1475  ;;  %2027 = vmatprep.mubr.msk.f32.mxu1 %vm2073_vm6, %v2071_v0 }
 0x2fd   : > { %v1477_v36 = vsel %vm707_vm12, %v1474_v34, %v1476_v33 }
 0x2fe   : > { %2021 = vmatpush3.msra.mxu0 %v1477_v36 }
 0x2ff   : > { %2023 = vmatmul.mubr.msk.f32.vlgmr.msra.gmra.mrb[14].mxu0 %vm1078_vm4, %v1904_v35  ;;  %2030 = vmatprep.subr.mxu0 %v2071_v0  ;;  %v1556_v38 = vpop.permute.xlu1 %1555 }
 0x300   : > { %v1558_v37 = vpop.permute.xlu0 %1557  ;;  %2032 = vmatprep.mubr.msk.f32.mxu0 %vm2073_vm6, %v2071_v0 }
 0x301   : > { %v1559_v40 = vsel %vm794_vm14, %v1556_v38, %v1558_v37 }
 0x302   : > { %2026 = vmatpush3.msra.mxu1 %v1559_v40 }
 0x303   : > { %2028 = vmatmul.mubr.msk.f32.vlgmr.msra.gmra.mrb[14].mxu1 %vm1078_vm4, %v1906_v39  ;;  %2035 = vmatprep.subr.mxu1 %v2071_v0  ;;  %v1638_v42 = vpop.permute.xlu1 %1637 }
 0x304   : > { %v1640_v41 = vpop.permute.xlu0 %1639  ;;  %2037 = vmatprep.mubr.msk.f32.mxu1 %vm2073_vm6, %v2071_v0 }
 0x305   : > { %v1641_v44 = vsel %vm881_vm15, %v1638_v42, %v1640_v41 }
 0x306   : > { %2031 = vmatpush3.msra.mxu0 %v1641_v44 }
 0x307   : > { %2033 = vmatmul.mubr.msk.f32.vlgmr.msra.gmra.mrb[16].mxu0 %vm1078_vm4, %v1908_v43  ;;  %v1720_v46 = vpop.permute.xlu1 %1719 }
 0x308   : > { %v1722_v45 = vpop.permute.xlu0 %1721 }
 0x309   : > { %v1723_v48 = vsel %vm968_vm0, %v1720_v46, %v1722_v45 }
 0x30a   : > { %2036 = vmatpush3.msra.mxu1 %v1723_v48 }
 0x30b   : > { %2038 = vmatmul.mubr.msk.f32.vlgmr.msra.gmra.mrb[16].mxu1 %vm1078_vm4, %v1910_v47 }
 0x318   : > { %v1803_v12 = vpop.permute.xlu1 %1802 }
 0x34e   : > { %v1221_v49 = vpop.f32.mrb[10].mxu0 }
 0x34f   : > { %v2004_v50 = vpop.f32.mrb[11].mxu0 }
 0x3c2   : > { %v1148_v51 = vpop.f32.mrb[8].mxu1 }
 0x3c3   : > { %v1222_v0 = vadd.f32 %v1221_v49, %v1148_v51  ;;  %v1999_v52 = vpop.f32.mrb[9].mxu1 }
 0x3c6   : > { %v1302_v53 = vpop.f32.mrb[10].mxu1 }
 0x3c7   : > { %v1306_v54 = vadd.f32 %v1302_v53, %v1222_v0  ;;  %v2009_v55 = vpop.f32.mrb[11].mxu1 }
 0x3ca   : > { %v1384_v56 = vpop.f32.mrb[12].mxu0 }
 0x3cb   : > { %v1388_v57 = vadd.f32 %v1384_v56, %v1306_v54  ;;  %v2014_v58 = vpop.f32.mrb[13].mxu0 }
 0x3ce   : > { %v1466_v59 = vpop.f32.mrb[12].mxu1 }
 0x3cf   : > { %v1470_v60 = vadd.f32 %v1466_v59, %v1388_v57  ;;  %v2019_v61 = vpop.f32.mrb[13].mxu1 }
 0x3d2   : > { %v1548_v62 = vpop.f32.mrb[14].mxu0 }
 0x3d3   : > { %v1552_v63 = vadd.f32 %v1548_v62, %v1470_v60  ;;  %v2024_v2 = vpop.f32.mrb[15].mxu0 }
 0x3d6   : > { %v1630_v3 = vpop.f32.mrb[14].mxu1 }
 0x3d7   : > { %v1634_v4 = vadd.f32 %v1630_v3, %v1552_v63  ;;  %v2029_v5 = vpop.f32.mrb[15].mxu1 }
 0x3da   : > { %v1712_v6 = vpop.f32.mrb[16].mxu0 }
 0x3db   : > { %v1716_v7 = vadd.f32 %v1712_v6, %v1634_v4  ;;  %v2034_v8 = vpop.f32.mrb[17].mxu0 }
 0x3de   : > { %v1794_v9 = vpop.f32.mrb[16].mxu1 }
 0x3df   : > { %v1798_v10 = vadd.f32 %v1794_v9, %v1716_v7  ;;  %v2039_v11 = vpop.f32.mrb[17].mxu1 }
 0x3e1   : > { %v1805_v13 = vadd.f32 %v1803_v12, %v1798_v10 }
 0x3e3   : > { %v1806_v14 = vmax.f32 %v1805_v13, 0.0 }
 0x3e5   : > { %1807 = vst [vmem:[%s246_s24] sm:$0xff] %v1806_v14 }
 0x3e6 PF: > { %s16_s21 = sadd.s32 1, %s2069_s21  }
 0x3e7   : > { %p13_p4 = scmp.ge.s32.totalorder %s16_s21, 4  }
 0x3e9   :  { %15 = sbr.rel (!%p13_p4) target bundleno = 1 (0x1), region = 90 }

</bundles_post_ra>
